<compile_context>
chip_gen: v7x
topology: tpu7x:2x2x1
jax: 0.10.0
libtpu: 0.0.40
codegen_flags: <defaults>
</compile_context>

<pallas_src>
import jax
import jax.numpy as jnp
from jax.experimental import pallas as pl
from jax.experimental.pallas import tpu as pltpu


def _linear_kernel(x_ref, w_ref, b_ref, o_ref):
    # x_ref: (TB, F) VMEM tile; w_ref: (1, F) VMEM (resident); b_ref: (1, 1) SMEM scalar
    # o_ref: (1, TB) VMEM lane-dense output row
    y = jax.lax.dot_general(
        w_ref[...], x_ref[...],
        dimension_numbers=(((1,), (1,)), ((), ())),  # contract feature axes -> (1, TB)
        preferred_element_type=jnp.float32,
    )
    o_ref[...] = (y + b_ref[0, 0]).astype(o_ref.dtype)


def _round_up(x, m):
    return ((x + m - 1) // m) * m


def _choose_batch_tile(batch, n_feature, itemsize=4,
                       per_buffer_budget=16 * 1024 * 1024):
    """Largest batch tile whose (TB, F) x-buffer fits the per-buffer VMEM budget.

    BlockSpec double-buffers inputs, so total input VMEM ~= 2 * budget; budget is chosen
    to stay comfortably inside v7x's 64 MiB physical VMEM.
    """
    b_rounded = _round_up(batch, 8)
    max_rows = max(8, (per_buffer_budget // (n_feature * itemsize)) // 8 * 8)
    tb = min(2048, max_rows, b_rounded)
    if tb >= 128:
        tb = (tb // 128) * 128  # lane-dense output rows (TB multiple of 128)
    return tb


def linearnet_forward(x, weight, bias, *, batch_tile=None):
    """Equivalent of PyTorch nn.Linear(n_feature, 1): y = x @ weight.T + bias.

    Args:
      x:      (batch, n_feature) float32
      weight: (1, n_feature) float32   (PyTorch layout)
      bias:   (1,) float32
    Returns:
      (batch, 1) float32
    """
    B, F = x.shape
    assert weight.shape == (1, F) and bias.shape == (1,)

    tb = batch_tile if batch_tile is not None else _choose_batch_tile(B, F)
    num_tiles = pl.cdiv(B, tb)
    b_pad = num_tiles * tb
    if b_pad != B:
        # Remainder handling: pad the last tile with zero rows; sliced off below.
        x = jnp.pad(x, ((0, b_pad - B), (0, 0)))

    b2 = bias.reshape(1, 1)  # scalar bias lives in SMEM

    # TODO(synk): if n_feature ever grows too large for a single (TB, F) VMEM block,
    # add a feature-axis grid dim with a VMEM accumulator (pl.when init/finalize).
    out = pl.pallas_call(
        _linear_kernel,
        out_shape=jax.ShapeDtypeStruct((num_tiles, tb), x.dtype),
        grid_spec=pltpu.PrefetchScalarGridSpec(
            num_scalar_prefetch=0,
            grid=(num_tiles,),
            in_specs=[
                pl.BlockSpec((tb, F), lambda i: (i, 0)),            # x tile (double-buffered)
                pl.BlockSpec((1, F), lambda i: (0, 0)),             # weight row, stays resident
                pl.BlockSpec(memory_space=pltpu.MemorySpace.SMEM),  # bias scalar in SMEM
            ],
            out_specs=pl.BlockSpec((1, tb), lambda i: (i, 0)),      # lane-dense output row
        ),
        compiler_params=pltpu.CompilerParams(
            dimension_semantics=("parallel",),     # shard batch tiles across TCs (v7x)
            vmem_limit_bytes=48 * 1024 * 1024,     # headroom for double-buffered tiles
        ),
        cost_estimate=pl.CostEstimate(
            flops=2 * b_pad * F,
            bytes_accessed=4 * (b_pad * F + F + b_pad),
            transcendentals=0,
        ),
    )(x, weight, b2)

    # (num_tiles, TB) lane-dense slab -> (B, 1) column, dropping batch padding.
    return out.reshape(-1)[:B].reshape(B, 1)


if __name__ == "__main__":
    key = jax.random.PRNGKey(0)
    k_x, k_w, k_b = jax.random.split(key, 3)

    batch, n_feature = 8, 32

    # Deterministic init mimicking PyTorch nn.Linear default: U(-1/sqrt(F), 1/sqrt(F))
    bound = 1.0 / (n_feature ** 0.5)
    weight = jax.random.uniform(k_w, (1, n_feature), jnp.float32, -bound, bound)
    bias = jax.random.uniform(k_b, (1,), jnp.float32, -bound, bound)

    x = jax.random.normal(k_x, (batch, n_feature), jnp.float32)

    y = linearnet_forward(x, weight, bias)
    y = jax.block_until_ready(y)

    # Reference check in plain JAX
    y_ref = x @ weight.T + bias
    assert y.shape == (batch, 1)
    assert jnp.allclose(y, y_ref, atol=1e-5), "mismatch vs reference"

    print("KERNEL_OK")
</pallas_src>

<mosaic_0001>
module attributes {stable_mosaic.version = 11 : i64} {
  func.func @_linear_kernel(%arg0: i32, %arg1: memref<8x32xf32, #tpu.memory_space<vmem>>, %arg2: memref<1x32xf32, #tpu.memory_space<vmem>>, %arg3: memref<1x1xf32, #tpu.memory_space<smem>>, %arg4: memref<1x8xf32, #tpu.memory_space<vmem>>) attributes {dimension_semantics = [#tpu.dimension_semantics<parallel>], iteration_bounds = array<i64: 1>, scalar_prefetch = 0 : i64, scratch_operands = 0 : i64, tpu.core_type = #tpu.core_type<tc>, window_params = [{transform_indices = @transform_0, window_bounds = array<i64: 8, 32>}, {pipeline_mode = #tpu.pipeline_mode<synchronous>, transform_indices = @transform_1, window_bounds = array<i64: 1, 32>}, {transform_indices = @transform_2, window_bounds = array<i64: 1, 1>}, {transform_indices = @transform_3, window_bounds = array<i64: 1, 8>}]} {
    %c0 = arith.constant 0 : index
    %c0_0 = arith.constant 0 : index
    %0 = vector.load %arg2[%c0, %c0_0] : memref<1x32xf32, #tpu.memory_space<vmem>>, vector<1x32xf32>
    %c0_1 = arith.constant 0 : index
    %c0_2 = arith.constant 0 : index
    %1 = vector.load %arg1[%c0_1, %c0_2] : memref<8x32xf32, #tpu.memory_space<vmem>>, vector<8x32xf32>
    %cst = arith.constant dense<0.000000e+00> : vector<1x8xf32>
    %2 = tpu.matmul %0, %1, %cst {dimension_numbers = #tpu.dot_dimension_numbers<[1], [1], [0], [0], [0, 0, 1, 0], [], []>} : vector<1x32xf32>, vector<8x32xf32>, vector<1x8xf32> -> vector<1x8xf32>
    %c0_3 = arith.constant 0 : index
    %c0_4 = arith.constant 0 : index
    %3 = memref.load %arg3[%c0_3, %c0_4] : memref<1x1xf32, #tpu.memory_space<smem>>
    %4 = vector.broadcast %3 : f32 to vector<1x8xf32>
    %5 = arith.addf %2, %4 : vector<1x8xf32>
    %c0_5 = arith.constant 0 : index
    %c0_6 = arith.constant 0 : index
    %6 = vector.load %arg4[%c0_5, %c0_6] : memref<1x8xf32, #tpu.memory_space<vmem>>, vector<1x8xf32>
    tpu.vector_store %arg4[%c0_5, %c0_6], %5 {strides = array<i32>} : memref<1x8xf32, #tpu.memory_space<vmem>>, vector<1x8xf32>,
    return
  }
  func.func @transform_0(%arg0: i32) -> (i32, i32) {
    %c0_i32 = arith.constant 0 : i32
    %c0_i32_0 = arith.constant 0 : i32
    return %arg0, %c0_i32 : i32, i32
  }
  func.func @transform_1(%arg0: i32) -> (i32, i32) {
    %c0_i32 = arith.constant 0 : i32
    %c0_i32_0 = arith.constant 0 : i32
    %c0_i32_1 = arith.constant 0 : i32
    return %c0_i32, %c0_i32_0 : i32, i32
  }
  func.func @transform_2(%arg0: i32) -> (i32, i32) {
    %c0_i32 = arith.constant 0 : i32
    %c0_i32_0 = arith.constant 0 : i32
    %c0_i32_1 = arith.constant 0 : i32
    return %c0_i32, %c0_i32_0 : i32, i32
  }
  func.func @transform_3(%arg0: i32) -> (i32, i32) {
    %c0_i32 = arith.constant 0 : i32
    %c0_i32_0 = arith.constant 0 : i32
    return %arg0, %c0_i32 : i32, i32
  }
}

</mosaic_0001>

<bundles_post_ra>
// kernel: tpu_custom_call.1
= control target key start
LH: loop header
LB: loop body
LE: loop exit
PB: predicated region body
PF: predicated region fallthrough
CT: control target
= control target key end

     0   :  { %9 = vsyncpa [#allocation4], 0  ;;  %s241_s0 = inlined_call_operand.hbm [shape: f32[8,32], index: 0, kind: input, shape index: {}]   ;;  %s242_s1 = inlined_call_operand.vmem [shape: f32[1,32], index: 1, kind: input, shape index: {}]   ;;  %s243_s2 = inlined_call_operand.<no memory space> [shape: f32[1,1], index: 2, kind: input, shape index: {}]   ;;  %s244_s3 = inlined_call_operand.hbm [shape: f32[1,8], index: 3, kind: output, shape index: {}]  }
   0x1   :  { %10 = vsyncpa [#allocation5], 0  ;;  %s187_s12 = smov [#allocation3]   ;;  %s139_s16 = scalar_lea.hbm %s241_s0, 128 }
   0x2   :  { %s17_s13 = sshll.u32 %s187_s12, 4  ;;  %p140_p0 = scmp.ne.s32.totalorder %s241_s0, %s139_s16  ;;  %s18_s13 = int_to_ptr.vmem [resolvable:$true] %s17_s13 }
   0x3   :  { %p143_p1 = scmp.lt.u32.totalorder %s139_s16, %s241_s0 }
   0x5   :  { %p145_p2 = pnand %p143_p1, %p140_p0 }
   0x7   :  { %148 = shalt.err (!%p145_p2)
}
   0x8   :  { %s149_s21 = scalar_lea.vmem %s18_s13, 128  ;;  %p154_p4 = scmp.lt.s32.totalorder %s18_s13, %s18_s13 }
   0x9   :  { %p150_p3 = scmp.ne.s32.totalorder %s18_s13, %s149_s21  ;;  %p155_p5 = scmp.lt.s32.totalorder %s149_s21, %s149_s21 }
   0xb   :  { %p156_p6 = por %p155_p5, %p154_p4 }
   0xd   :  { %p157_p7 = pnand %p156_p6, %p150_p3 }
   0xf   :  { %160 = shalt.err (!%p157_p7)
}
  0x10   :  { %20 = dma.hbm_to_vmem [thread:$0]  %s241_s0, 128, %s18_s13, [#allocation4]  }
  0x11   :  { %183 = dma.done.wait [#allocation4], 128  }
  0x12   :  { %184 = vsyncadd [#allocation4], 4294967168  ;;  %v188_v0 = vmov 0.0   ;;  %vm189_vm0 = vmmov 0   ;;  %vm32_vm1 = vcmask 261120   ;;  %v29_v1 = vld [vmem:[#allocation3] sm:$0xff]  ;;  %v31_v3 = vstv %s243_s2 }
  0x13   :  { %130 = vmatprep.subr.mxu0 %v188_v0  ;;  %132 = vmatprep.mubr.msk.f32.mxu0 %vm189_vm0, %v188_v0  ;;  %v28_v2 = vld [vmem:[%s242_s1] sm:$0x1]  ;;  %s190_s28 = smov [#allocation6]   ;;  %vm109_vm2 = vcmask 57344  }
  0x14   :  { %131 = vmatpush3.xpose.msk.msra.mxu0 %vm32_vm1, %v29_v1  ;;  %s117_s0 = sshll.u32 %s190_s28, 4  ;;  %s118_s0 = int_to_ptr.vmem [resolvable:$true] %s117_s0 }
  0x15   :  { %s161_s29 = scalar_lea.vmem %s118_s0, 16  ;;  %s165_s30 = scalar_lea.vmem %s118_s0, 32 }
  0x16   :  { %p162_p8 = scmp.ne.s32.totalorder %s118_s0, %s161_s29  ;;  %p166_p9 = scmp.lt.s32.totalorder %s118_s0, %s118_s0 }
  0x17   :  { %133 = vmatmul.mubr.msk.f32.vlgmr.msra.gmra.mrb[0].mxu0 %vm32_vm1, %v28_v2  ;;  %p167_p10 = scmp.lt.s32.totalorder %s165_s30, %s161_s29 }
  0x19   :  { %p168_p11 = por %p167_p10, %p166_p9 }
  0x1b   :  { %p169_p12 = pnand %p168_p11, %p162_p8 }
  0xea   :  { %v105_v4 = vpop.f32.mrb[0].mxu0 }
  0xeb   :  { %v106_v5 = vadd.f32 %v105_v4, %v31_v3  ;;  %v134_v6 = vpop.f32.mrb[1].mxu0 }
  0xed   :  { %110 = vst.msk [vmem:[#allocation6] sm:$0x1] %vm109_vm2, %v106_v5 }
  0xee   :  { %172 = shalt.err (!%p169_p12)
}
  0xef   :  { %s173_s2 = scalar_lea.hbm %s244_s3, 16 }
  0xf0   :  { %p174_p13 = scmp.ne.s32.totalorder %s244_s3, %s173_s2  ;;  %p177_p0 = scmp.lt.u32.totalorder %s173_s2, %s244_s3 }
  0xf2   :  { %p179_p1 = pnand %p177_p0, %p174_p13 }
  0xf4   :  { %182 = shalt.err (!%p179_p1)
}
  0xf5   :  { %120 = dma.vmem_to_hbm [thread:$0]  %s118_s0, 16, %s244_s3, [#allocation5]  }
  0xf6   :  { %185 = dma.done.wait [#allocation5], 16  }
  0xf7   :  { %186 = vsyncadd [#allocation5], 4294967280 }
  0xf8   :  { %124 = vsyncpa [#allocation4], 1 }
  0xf9   :  { %125 = vsyncpa [#allocation5], 1 }

</bundles_post_ra>
